<compile_context>
chip_gen: v7x
topology: tpu7x:2x2x1
jax: 0.10.0
libtpu: 0.0.40
codegen_flags: <defaults>
</compile_context>

<pallas_src>
import functools

import jax
import jax.numpy as jnp
from jax.experimental import pallas as pl
from jax.experimental.pallas import tpu as pltpu


def _round_up(x, m):
    return (x + m - 1) // m * m


def _gumbel_softmax_kernel(alpha_ref, u_ref, sg_ref, ss_ref, *maybe_y_ref,
                           inv_temp, eps, n_class):
    """One block = (rows, C) of logits.  Pure element-wise + lane reductions."""
    a = alpha_ref[...].astype(jnp.float32)

    # ---- plain softmax(alpha) first (shorter live ranges -> lower VMEM peak) ----
    a2 = a - jnp.max(a, axis=-1, keepdims=True)
    q = jnp.exp(a2)
    ss = q * (1.0 / jnp.sum(q, axis=-1, keepdims=True))      # one (rows,1) divide
    ss_ref[...] = ss.astype(ss_ref.dtype)

    # ---- Gumbel path: softmax((alpha + g)/T) with g = -log(eps - log(u + eps)) ----
    u = u_ref[...].astype(jnp.float32)
    g = -jnp.log(eps - jnp.log(u + eps))                      # matches sample_gumbel_like
    z = (a + g) * inv_temp
    z = z - jnp.max(z, axis=-1, keepdims=True)
    p = jnp.exp(z)
    sg = jnp.maximum(p * (1.0 / jnp.sum(p, axis=-1, keepdims=True)), eps)
    sg_ref[...] = sg.astype(sg_ref.dtype)

    if maybe_y_ref:
        # Fused eval / force_hard path: one_hot(argmax(sg)) computed on data
        # already in VMEM (first-match tie-break), no extra HBM pass.
        y_ref = maybe_y_ref[0]
        col = jax.lax.broadcasted_iota(jnp.int32, sg.shape, 1)
        row_max = jnp.max(sg, axis=-1, keepdims=True)
        idx = jnp.min(jnp.where(sg >= row_max, col, jnp.int32(n_class)),
                      axis=-1, keepdims=True)
        y_ref[...] = (col == idx).astype(y_ref.dtype)


def _pick_row_block(batch, n_class):
    """Rows per grid step: VMEM-aware, near-equal chunks, multiple-of-8."""
    # ~(2 inputs + 3 outputs) x 2 pipeline buffers + ~6 compiler temporaries,
    # all f32 block-sized  ->  ~16 block copies.  Keep them under ~12 MiB so we
    # stay below the scoped-VMEM default on every generation.
    bytes_per_row = 16 * n_class * 4
    vmem_rows = max(8, (12 * 1024 * 1024 // bytes_per_row) // 8 * 8)
    cap = min(256, vmem_rows)          # <=256 keeps >=2 grid steps for v7x's 2 TCs
    n_chunks = pl.cdiv(batch, cap)
    if n_chunks == 1 and batch >= 128:
        n_chunks = 2                   # give v7x's second TensorCore work
    if n_chunks == 1:
        return batch                   # single block == full array dim (always legal)
    return _round_up(pl.cdiv(batch, n_chunks), 8)


def gumbel_softmax_forward(alpha, key, *, temp=1.0, hard=False, eps=1e-10,
                           out_dtype=None):
    """Pallas TPU forward of GumbelSoftmax on 2-D logits [batch, n_class].

    hard=False -> training-mode path:  y = soft gumbel samples
    hard=True  -> eval / force_hard:   y = one_hot(argmax(soft gumbel samples))
    Returns (y, soft_samples_gumble, soft_samples) like the PyTorch forward.
    """
    assert alpha.ndim == 2, "GumbelSoftmax expects [batch_size, n_class] logits"
    B, C = alpha.shape
    # Mirrors the module: `if not temp: temp = 1` (so temp=None/0 -> 1).
    temp = float(temp) if temp else 1.0
    out_dtype = out_dtype or alpha.dtype

    # Uniform(0,1) noise for the reparameterised Gumbel draw.  Generated by
    # XLA's fused RNG (single write pass); the in-kernel hardware PRNG has no
    # interpret-mode lowering, so it cannot be used portably.
    u = jax.random.uniform(key, (B, C), dtype=jnp.float32)

    row_block = _pick_row_block(B, C)
    grid = (pl.cdiv(B, row_block),)

    kern = functools.partial(_gumbel_softmax_kernel,
                             inv_temp=float(1.0 / temp), eps=float(eps),
                             n_class=C)

    n_out = 3 if hard else 2
    out_shapes = tuple(jax.ShapeDtypeStruct((B, C), out_dtype)
                       for _ in range(n_out))
    spec = pl.BlockSpec((row_block, C), lambda i: (i, 0))

    outs = pl.pallas_call(
        kern,
        out_shape=out_shapes,
        grid_spec=pltpu.PrefetchScalarGridSpec(
            num_scalar_prefetch=0,
            grid=grid,
            in_specs=[spec, spec],
            out_specs=tuple(spec for _ in range(n_out)),
        ),
        compiler_params=pltpu.CompilerParams(
            dimension_semantics=("parallel",),
            vmem_limit_bytes=32 * 1024 * 1024),
    )(alpha, u)

    sg, ss = outs[0], outs[1]
    # TODO(synk): the straight-through gradient (y_hard - sg.detach() + sg) is a
    # backward-pass-only detail; the forward value equals the one-hot exactly.
    y = outs[2] if hard else sg
    return y, sg, ss


if __name__ == "__main__":
    key = jax.random.PRNGKey(0)
    k_alpha, k_noise, k_noise_hard = jax.random.split(key, 3)
    B, C = 8, 32
    alpha = jax.random.normal(k_alpha, (B, C), dtype=jnp.float32)
    temp = 0.7
    eps = 1e-10
    inv_temp = jnp.float32(1.0 / temp)

    # --- soft (training-default) path ---
    y, sg, ss = gumbel_softmax_forward(alpha, k_noise, temp=temp)
    jax.block_until_ready((y, sg, ss))

    # soft_samples == softmax(alpha): deterministic -> direct check.
    assert jnp.allclose(ss, jax.nn.softmax(alpha, axis=-1), rtol=1e-5, atol=1e-6), \
        "soft_samples mismatch"

    # reference gumbel softmax, recomputed with the same uniform draws.
    u = jax.random.uniform(k_noise, (B, C), dtype=jnp.float32)
    g = -jnp.log(eps - jnp.log(u + eps))
    z = (alpha + g) * inv_temp
    sg_ref = jnp.maximum(jax.nn.softmax(z - z.max(-1, keepdims=True), axis=-1), eps)
    assert jnp.allclose(sg, sg_ref, rtol=1e-5, atol=1e-6), "gumbel samples mismatch"

    # soft path: y == soft gumbel samples; rows are valid distributions.
    assert jnp.allclose(y, sg)
    assert jnp.allclose(jnp.sum(sg, axis=-1), 1.0, atol=1e-4)
    assert bool(jnp.all(sg >= eps)) and bool(jnp.all(jnp.isfinite(sg)))

    # --- hard (eval / force_hard) path: fused one-hot output ---
    y_hard, sg_h, _ = gumbel_softmax_forward(alpha, k_noise_hard, temp=temp, hard=True)
    jax.block_until_ready(y_hard)
    assert y_hard.shape == (B, C)
    assert jnp.allclose(jnp.sum(y_hard, axis=-1), 1.0)
    assert bool(jnp.all((y_hard == 0.0) | (y_hard == 1.0)))
    assert bool(jnp.all(jnp.argmax(y_hard, axis=-1) == jnp.argmax(sg_h, axis=-1)))

    print("KERNEL_OK")
</pallas_src>

<mosaic_0001>
module attributes {stable_mosaic.version = 11 : i64} {
  func.func @_gumbel_softmax_kernel(%arg0: i32, %arg1: memref<8x32xf32, #tpu.memory_space<vmem>>, %arg2: memref<8x32xf32, #tpu.memory_space<vmem>>, %arg3: memref<8x32xf32, #tpu.memory_space<vmem>>, %arg4: memref<8x32xf32, #tpu.memory_space<vmem>>) attributes {dimension_semantics = [#tpu.dimension_semantics<parallel>], iteration_bounds = array<i64: 1>, scalar_prefetch = 0 : i64, scratch_operands = 0 : i64, tpu.core_type = #tpu.core_type<tc>, window_params = [{transform_indices = @transform_0, window_bounds = array<i64: 8, 32>}, {transform_indices = @transform_1, window_bounds = array<i64: 8, 32>}, {transform_indices = @transform_2, window_bounds = array<i64: 8, 32>}, {transform_indices = @transform_3, window_bounds = array<i64: 8, 32>}]} {
    %c0 = arith.constant 0 : index
    %c0_0 = arith.constant 0 : index
    %0 = vector.load %arg1[%c0, %c0_0] : memref<8x32xf32, #tpu.memory_space<vmem>>, vector<8x32xf32>
    %cst = arith.constant dense<0xFF800000> : vector<8xf32>
    %1 = vector.multi_reduction <maximumf>, %0, %cst [1] : vector<8x32xf32> to vector<8xf32>
    %2 = vector.shape_cast %1 : vector<8xf32> to vector<8x1xf32>
    %3 = vector.broadcast %2 : vector<8x1xf32> to vector<8x32xf32>
    %4 = arith.subf %0, %3 : vector<8x32xf32>
    %5 = math.exp %4 : vector<8x32xf32>
    %cst_1 = arith.constant dense<0.000000e+00> : vector<8xf32>
    %6 = vector.multi_reduction <add>, %5, %cst_1 [1] : vector<8x32xf32> to vector<8xf32>
    %7 = vector.shape_cast %6 : vector<8xf32> to vector<8x1xf32>
    %cst_2 = arith.constant 1.000000e+00 : f32
    %8 = vector.broadcast %cst_2 : f32 to vector<8x1xf32>
    %9 = arith.divf %8, %7 : vector<8x1xf32>
    %10 = vector.broadcast %9 : vector<8x1xf32> to vector<8x32xf32>
    %11 = arith.mulf %5, %10 : vector<8x32xf32>
    %c0_3 = arith.constant 0 : index
    %c0_4 = arith.constant 0 : index
    %12 = vector.load %arg4[%c0_3, %c0_4] : memref<8x32xf32, #tpu.memory_space<vmem>>, vector<8x32xf32>
    tpu.vector_store %arg4[%c0_3, %c0_4], %11 {strides = array<i32>} : memref<8x32xf32, #tpu.memory_space<vmem>>, vector<8x32xf32>,
    %c0_5 = arith.constant 0 : index
    %c0_6 = arith.constant 0 : index
    %13 = vector.load %arg2[%c0_5, %c0_6] : memref<8x32xf32, #tpu.memory_space<vmem>>, vector<8x32xf32>
    %cst_7 = arith.constant 1.000000e-10 : f32
    %14 = vector.broadcast %cst_7 : f32 to vector<8x32xf32>
    %15 = arith.addf %13, %14 : vector<8x32xf32>
    %16 = math.log %15 : vector<8x32xf32>
    %cst_8 = arith.constant 1.000000e-10 : f32
    %17 = vector.broadcast %cst_8 : f32 to vector<8x32xf32>
    %18 = arith.subf %17, %16 : vector<8x32xf32>
    %19 = math.log %18 : vector<8x32xf32>
    %cst_9 = arith.constant 0.000000e+00 : f32
    %20 = vector.broadcast %cst_9 : f32 to vector<8x32xf32>
    %21 = arith.subf %20, %19 : vector<8x32xf32>
    %22 = arith.addf %0, %21 : vector<8x32xf32>
    %cst_10 = arith.constant 1.42857146 : f32
    %23 = vector.broadcast %cst_10 : f32 to vector<8x32xf32>
    %24 = arith.mulf %22, %23 : vector<8x32xf32>
    %cst_11 = arith.constant dense<0xFF800000> : vector<8xf32>
    %25 = vector.multi_reduction <maximumf>, %24, %cst_11 [1] : vector<8x32xf32> to vector<8xf32>
    %26 = vector.shape_cast %25 : vector<8xf32> to vector<8x1xf32>
    %27 = vector.broadcast %26 : vector<8x1xf32> to vector<8x32xf32>
    %28 = arith.subf %24, %27 : vector<8x32xf32>
    %29 = math.exp %28 : vector<8x32xf32>
    %cst_12 = arith.constant dense<0.000000e+00> : vector<8xf32>
    %30 = vector.multi_reduction <add>, %29, %cst_12 [1] : vector<8x32xf32> to vector<8xf32>
    %31 = vector.shape_cast %30 : vector<8xf32> to vector<8x1xf32>
    %cst_13 = arith.constant 1.000000e+00 : f32
    %32 = vector.broadcast %cst_13 : f32 to vector<8x1xf32>
    %33 = arith.divf %32, %31 : vector<8x1xf32>
    %34 = vector.broadcast %33 : vector<8x1xf32> to vector<8x32xf32>
    %35 = arith.mulf %29, %34 : vector<8x32xf32>
    %cst_14 = arith.constant 1.000000e-10 : f32
    %36 = vector.broadcast %cst_14 : f32 to vector<8x32xf32>
    %37 = arith.maximumf %35, %36 : vector<8x32xf32>
    %c0_15 = arith.constant 0 : index
    %c0_16 = arith.constant 0 : index
    %38 = vector.load %arg3[%c0_15, %c0_16] : memref<8x32xf32, #tpu.memory_space<vmem>>, vector<8x32xf32>
    tpu.vector_store %arg3[%c0_15, %c0_16], %37 {strides = array<i32>} : memref<8x32xf32, #tpu.memory_space<vmem>>, vector<8x32xf32>,
    return
  }
  func.func @transform_0(%arg0: i32) -> (i32, i32) {
    %c0_i32 = arith.constant 0 : i32
    %c0_i32_0 = arith.constant 0 : i32
    return %arg0, %c0_i32 : i32, i32
  }
  func.func @transform_1(%arg0: i32) -> (i32, i32) {
    %c0_i32 = arith.constant 0 : i32
    %c0_i32_0 = arith.constant 0 : i32
    return %arg0, %c0_i32 : i32, i32
  }
  func.func @transform_2(%arg0: i32) -> (i32, i32) {
    %c0_i32 = arith.constant 0 : i32
    %c0_i32_0 = arith.constant 0 : i32
    return %arg0, %c0_i32 : i32, i32
  }
  func.func @transform_3(%arg0: i32) -> (i32, i32) {
    %c0_i32 = arith.constant 0 : i32
    %c0_i32_0 = arith.constant 0 : i32
    return %arg0, %c0_i32 : i32, i32
  }
}

</mosaic_0001>

<bundles_post_ra>
// kernel: tpu_custom_call.1
= control target key start
LH: loop header
LB: loop body
LE: loop exit
PB: predicated region body
PF: predicated region fallthrough
CT: control target
= control target key end

     0   :  { %9 = vsyncpa [#allocation3], 0  ;;  %s298_s0 = inlined_call_operand.hbm [shape: f32[8,32], index: 0, kind: input, shape index: {}]   ;;  %s299_s1 = inlined_call_operand.hbm [shape: f32[8,32], index: 1, kind: input, shape index: {}]   ;;  %s300_s2 = inlined_call_operand.hbm [shape: f32[8,32], index: 2, kind: output, shape index: {0}]   ;;  %s301_s3 = inlined_call_operand.hbm [shape: f32[8,32], index: 3, kind: output, shape index: {1}]  }
   0x1   :  { %10 = vsyncpa [#allocation6], 0 }
   0x2   :  { %11 = vsyncpa [#allocation4], 0 }
   0x3   :  { %12 = vsyncpa [#allocation9], 0  ;;  %s220_s12 = smov [#allocation2]   ;;  %s221_s14 = smov [#allocation5]  }
   0x4   :  { %s19_s13 = sshll.u32 %s220_s12, 4  ;;  %s29_s15 = sshll.u32 %s221_s14, 4  ;;  %s20_s13 = int_to_ptr.vmem [resolvable:$true] %s19_s13  ;;  %s30_s15 = int_to_ptr.vmem [resolvable:$true] %s29_s15 }
   0x5   :  { %s124_s18 = scalar_lea.hbm %s298_s0, 128 }
   0x6   :  { %p125_p0 = scmp.ne.s32.totalorder %s298_s0, %s124_s18  ;;  %p128_p1 = scmp.lt.u32.totalorder %s124_s18, %s298_s0 }
   0x8   :  { %p130_p2 = pnand %p128_p1, %p125_p0 }
   0xa   :  { %133 = shalt.err (!%p130_p2)
}
   0xb   :  { %s134_s23 = scalar_lea.vmem %s20_s13, 128  ;;  %p139_p4 = scmp.lt.s32.totalorder %s20_s13, %s20_s13 }
   0xc   :  { %p135_p3 = scmp.ne.s32.totalorder %s20_s13, %s134_s23  ;;  %p140_p5 = scmp.lt.s32.totalorder %s134_s23, %s134_s23 }
   0xe   :  { %p141_p6 = por %p140_p5, %p139_p4 }
  0x10   :  { %p142_p7 = pnand %p141_p6, %p135_p3 }
  0x12   :  { %145 = shalt.err (!%p142_p7)
}
  0x13   :  { %22 = dma.hbm_to_vmem [thread:$0]  %s298_s0, 128, %s20_s13, [#allocation3]  }
  0x14   :  { %s146_s28 = scalar_lea.hbm %s299_s1, 128 }
  0x15   :  { %p147_p8 = scmp.ne.s32.totalorder %s299_s1, %s146_s28  ;;  %p150_p9 = scmp.lt.u32.totalorder %s146_s28, %s299_s1 }
  0x17   :  { %p152_p10 = pnand %p150_p9, %p147_p8 }
  0x19   :  { %155 = shalt.err (!%p152_p10)
}
  0x1a   :  { %s156_s6 = scalar_lea.vmem %s30_s15, 128  ;;  %p161_p12 = scmp.lt.s32.totalorder %s30_s15, %s30_s15 }
  0x1b   :  { %p157_p11 = scmp.ne.s32.totalorder %s30_s15, %s156_s6  ;;  %p162_p13 = scmp.lt.s32.totalorder %s156_s6, %s156_s6 }
  0x1d   :  { %p163_p0 = por %p162_p13, %p161_p12 }
  0x1f   :  { %p164_p1 = pnand %p163_p0, %p157_p11 }
  0x21   :  { %167 = shalt.err (!%p164_p1)
}
  0x22   :  { %32 = dma.hbm_to_vmem [thread:$0]  %s299_s1, 128, %s30_s15, [#allocation6]  }
  0x23   :  { %212 = dma.done.wait [#allocation3], 128  }
  0x24   :  { %213 = vsyncadd [#allocation3], 4294967168 }
  0x25   :  { %214 = dma.done.wait [#allocation6], 128  }
  0x26   :  { %215 = vsyncadd [#allocation6], 4294967168  ;;  %v54_v0 = vld [vmem:[#allocation5] sm:$0xff]  ;;  %v39_v7 = vld [vmem:[#allocation2] sm:$0xff]  ;;  %vm40_vm0 = vcmask 261120   ;;  %s222_s1 = smov [#allocation7]  }
  0x27   :  { %v55_v1 = vadd.f32 1e-10, %v54_v0  ;;  %v41_v12 = vsel %vm40_vm0, %v39_v7, -inf  ;;  %s84_s8 = sshll.u32 %s222_s1, 4  ;;  %s223_s9 = smov [#allocation8]   ;;  %s85_s8 = int_to_ptr.vmem [resolvable:$true] %s84_s8 }
  0x28   :  { %s94_s10 = sshll.u32 %s223_s9, 4  ;;  %s168_s11 = scalar_lea.vmem %s85_s8, 128  ;;  %s95_s10 = int_to_ptr.vmem [resolvable:$true] %s94_s10 }
  0x29   :  { %112 = vlog2.f32 %v55_v1  ;;  %p169_p2 = scmp.ne.s32.totalorder %s85_s8, %s168_s11  ;;  %p173_p3 = scmp.lt.s32.totalorder %s85_s8, %s85_s8 }
  0x2a   :  { %p174_p4 = scmp.lt.s32.totalorder %s168_s11, %s168_s11 }
  0x2c   :  { %p175_p5 = por %p174_p4, %p173_p3 }
  0x2e   :  { %p176_p6 = pnand %p175_p5, %p169_p2 }
  0x33   :  { %v113_v2 = vpop.eup %112 }
  0x34   :  { %v57_v3 = vmul.f32 0.6931472, %v113_v2 }
  0x36   :  { %v58_v4 = vsub.f32 1e-10, %v57_v3 }
  0x38   :  { %114 = vlog2.f32 %v58_v4 }
  0x42   :  { %v115_v5 = vpop.eup %114 }
  0x43   :  { %v60_v6 = vmul.f32 0.6931472, %v115_v5 }
  0x45   :  { %v61_v8 = vsub.f32 0.0, %v60_v6 }
  0x47   :  { %v62_v9 = vadd.f32 %v61_v8, %v39_v7 }
  0x49   :  { %v63_v10 = vmul.f32 1.4285715, %v62_v9 }
  0x4b   :  { %v64_v11 = vsel %vm40_vm0, %v63_v10, -inf }
  0x4c   :  { %65 = vmax.xlane.f32.xlu0 %v64_v11 }
  0x50   :  { %42 = vmax.xlane.f32.xlu0 %v41_v12 }
  0xd9   :  { %v66_v13 = vpop.xlane.xlu0 %65 }
  0xda   :  { %v67_v14 = vsub.f32 %v63_v10, %v66_v13 }
  0xdc   :  { %v68_v15 = vmul.f32 1.442695, %v67_v14 }
  0xdd   :  { %v43_v16 = vpop.xlane.xlu0 %42 }
  0xde   :  { %116 = vpow2.f32 %v68_v15  ;;  %v44_v17 = vsub.f32 %v39_v7, %v43_v16 }
  0xe0   :  { %v45_v18 = vmul.f32 1.442695, %v44_v17 }
  0xe2   :  { %118 = vpow2.f32 %v45_v18 }
  0xe8   :  { %v117_v19 = vpop.eup %116 }
  0xe9   :  { %v70_v20 = vsel %vm40_vm0, %v117_v19, 0.0 }
  0xea   :  { %71 = vadd.xlane.f32.xlu1 %v70_v20 }
  0xec   :  { %v119_v21 = vpop.eup %118 }
  0xed   :  { %v47_v22 = vsel %vm40_vm0, %v119_v21, 0.0 }
  0xee   :  { %48 = vadd.xlane.f32.xlu1 %v47_v22 }
 0x177   :  { %v72_v23 = vpop.xlane.xlu1 %71 }
 0x178   :  { %120 = vrcp.f32 %v72_v23 }
 0x17b   :  { %v49_v24 = vpop.xlane.xlu1 %48 }
 0x17c   :  { %122 = vrcp.f32 %v49_v24 }
 0x182   :  { %v121_v25 = vpop.eup %120 }
 0x183   :  { %v75_v26 = vmul.f32 %v121_v25, %v117_v19 }
 0x185   :  { %v76_v27 = vmax.f32 %v75_v26, 1e-10 }
 0x186   :  { %v123_v28 = vpop.eup %122 }
 0x187   :  { %77 = vst.msk [vmem:[#allocation7] sm:$0xff] %vm40_vm0, %v76_v27  ;;  %v52_v29 = vmul.f32 %v123_v28, %v119_v21 }
 0x188   :  { %179 = shalt.err (!%p176_p6)
}
 0x189   :  { %s180_s14 = scalar_lea.hbm %s300_s2, 128 }
 0x18a   :  { %p181_p7 = scmp.ne.s32.totalorder %s300_s2, %s180_s14  ;;  %p184_p8 = scmp.lt.u32.totalorder %s180_s14, %s300_s2 }
 0x18c   :  { %p186_p9 = pnand %p184_p8, %p181_p7 }
 0x18e   :  { %189 = shalt.err (!%p186_p9)
}
 0x18f   :  { %87 = dma.vmem_to_hbm [thread:$0]  %s85_s8, 128, %s300_s2, [#allocation4]   ;;  %53 = vst.msk [vmem:[#allocation8] sm:$0xff] %vm40_vm0, %v52_v29 }
 0x190   :  { %s190_s21 = scalar_lea.vmem %s95_s10, 128  ;;  %p195_p11 = scmp.lt.s32.totalorder %s95_s10, %s95_s10 }
 0x191   :  { %p191_p10 = scmp.ne.s32.totalorder %s95_s10, %s190_s21  ;;  %p196_p12 = scmp.lt.s32.totalorder %s190_s21, %s190_s21 }
 0x193   :  { %p197_p13 = por %p196_p12, %p195_p11 }
 0x195   :  { %p198_p0 = pnand %p197_p13, %p191_p10 }
 0x197   :  { %201 = shalt.err (!%p198_p0)
}
 0x198   :  { %s202_s24 = scalar_lea.hbm %s301_s3, 128 }
 0x199   :  { %p203_p1 = scmp.ne.s32.totalorder %s301_s3, %s202_s24  ;;  %p206_p2 = scmp.lt.u32.totalorder %s202_s24, %s301_s3 }
 0x19b   :  { %p208_p3 = pnand %p206_p2, %p203_p1 }
 0x19d   :  { %211 = shalt.err (!%p208_p3)
}
 0x19e   :  { %97 = dma.vmem_to_hbm [thread:$0]  %s95_s10, 128, %s301_s3, [#allocation9]  }
 0x19f   :  { %216 = dma.done.wait [#allocation4], 128  }
 0x1a0   :  { %217 = vsyncadd [#allocation4], 4294967168 }
 0x1a1   :  { %218 = dma.done.wait [#allocation9], 128  }
 0x1a2   :  { %219 = vsyncadd [#allocation9], 4294967168 }
 0x1a3   :  { %104 = vsyncpa [#allocation3], 1 }
 0x1a4   :  { %105 = vsyncpa [#allocation6], 1 }
 0x1a5   :  { %106 = vsyncpa [#allocation4], 1 }
 0x1a6   :  { %107 = vsyncpa [#allocation9], 1 }

</bundles_post_ra>
